<compile_context>
chip_gen: v7x
topology: tpu7x:2x2x1
jax: 0.10.0
libtpu: 0.0.40
codegen_flags: <defaults>
</compile_context>

<pallas_src>
import functools

import jax
import jax.numpy as jnp
from jax.experimental import pallas as pl
from jax.experimental.pallas import tpu as pltpu

_VMEM_LIMIT_BYTES = 48 * 1024 * 1024     # safe on v5e/v6e (128 MiB) and v7x (64 MiB)
_TARGET_BLOCK_BYTES = 4 * 1024 * 1024    # ~85%+ of HBM roofline, 4x fits all gens


def _choose_tiles(N, C, L, itemsize):
    """Pick (N-tile, L-tile) so one block is ~4 MiB of (sublane-padded) VMEM."""
    c_pad = max(8, ((C + 7) // 8) * 8)          # sublane-padded channel footprint
    if L <= 2048:
        lb = L                                  # full spatial extent on lanes
    else:
        lb = 2048
        for cand in (4096, 2048, 1024, 512, 256, 128):
            if cand <= L and L % cand == 0:     # prefer lane tiles that divide L
                lb = cand
                break
    per_n = c_pad * lb * itemsize
    nb = int(max(1, min(N, _TARGET_BLOCK_BYTES // per_n)))
    return nb, int(lb)


# ----------------------------------------------------------------------------
# Kernel 1: per-channel statistics reduction (accumulate into resident output)
# ----------------------------------------------------------------------------
def _stats_kernel(x_ref, rm_ref, out_ref, *, nb, lb, n_tot, l_tot,
                  shard_l, n_shard, l_shard, need_mask):
    s_id = pl.program_id(0)      # partial-sum shard ("parallel", megacore)
    n_id = pl.program_id(1)      # N-tile   ("arbitrary", reduction)
    l_id = pl.program_id(2)      # L-tile   ("arbitrary", reduction)

    @pl.when(jnp.logical_and(n_id == 0, l_id == 0))
    def _():
        out_ref[...] = jnp.zeros_like(out_ref)

    x = x_ref[...].astype(jnp.float32)          # (nb, C, lb) — upcast in-kernel
    rm = rm_ref[...]                            # (1, C, 1), lane-broadcast

    if need_mask:                               # static: only emitted if ragged
        if shard_l:
            n0 = n_id * nb
            l0 = (s_id * l_shard + l_id) * lb
        else:
            n0 = (s_id * n_shard + n_id) * nb
            l0 = l_id * lb
        rows = n0 + jax.lax.broadcasted_iota(jnp.int32, (nb, 1, lb), 0)
        lanes = l0 + jax.lax.broadcasted_iota(jnp.int32, (nb, 1, lb), 2)
        mask = jnp.logical_and(rows < n_tot, lanes < l_tot)
        x = jnp.where(mask, x, 0.0)
        d = jnp.where(mask, x - rm, 0.0)
    else:
        d = x - rm

    xs = jnp.sum(x, axis=0)                     # (C, lb)  cheap VPU adds
    ds = jnp.sum(d * d, axis=0)                 # (C, lb)
    s_c = jnp.sum(xs, axis=1, keepdims=True)    # (C, 1)   lane reduce (XLU)
    ss_c = jnp.sum(ds, axis=1, keepdims=True)   # (C, 1)
    out_ref[...] += jnp.concatenate([s_c, ss_c], axis=1)[None]   # (1, C, 2)


def _channel_stats(x3, running_mean, nb, lb):
    """x3: (N, C, L) any float dtype; returns (sum_c, sumsq_c) each (C,) f32."""
    N, C, L = x3.shape
    nN = pl.cdiv(N, nb)
    nL = pl.cdiv(L, lb)

    # Two partial-sum shards when the tile count allows it (lets v7x run the
    # reduction on both TensorCores); harmless (sequential) on v5e/v6e.
    if nL % 2 == 0:
        n_shards, shard_l = 2, True
    elif nN % 2 == 0:
        n_shards, shard_l = 2, False
    else:
        n_shards, shard_l = 1, True
    l_shard = nL // n_shards if shard_l else nL
    n_shard = nN if shard_l else nN // n_shards

    if shard_l:
        x_map = lambda s, n, l: (n, 0, s * l_shard + l)
    else:
        x_map = lambda s, n, l: (s * n_shard + n, 0, l)

    need_mask = (N % nb != 0) or (L % lb != 0)

    kernel = functools.partial(
        _stats_kernel, nb=nb, lb=lb, n_tot=N, l_tot=L, shard_l=shard_l,
        n_shard=n_shard, l_shard=l_shard, need_mask=need_mask)

    partials = pl.pallas_call(
        kernel,
        out_shape=jax.ShapeDtypeStruct((n_shards, C, 2), jnp.float32),
        grid_spec=pltpu.PrefetchScalarGridSpec(
            num_scalar_prefetch=0,
            grid=(n_shards, n_shard, l_shard),
            in_specs=[
                pl.BlockSpec((nb, C, lb), x_map),
                pl.BlockSpec((1, C, 1), lambda s, n, l: (0, 0, 0)),
            ],
            out_specs=pl.BlockSpec((1, C, 2), lambda s, n, l: (s, 0, 0)),
        ),
        compiler_params=pltpu.CompilerParams(
            dimension_semantics=("parallel", "arbitrary", "arbitrary"),
            vmem_limit_bytes=_VMEM_LIMIT_BYTES),
    )(x3, running_mean.reshape(1, C, 1).astype(jnp.float32))

    sums = jnp.sum(partials, axis=0)            # (C, 2) add the shard partials
    return sums[:, 0], sums[:, 1]


# ----------------------------------------------------------------------------
# Kernel 2: elementwise normalization  out = x * scale + shift
# ----------------------------------------------------------------------------
def _bn_kernel(x_ref, scale_ref, shift_ref, o_ref):
    x = x_ref[...].astype(jnp.float32)                    # (nb, C, lb)
    o_ref[...] = (x * scale_ref[...] + shift_ref[...]).astype(o_ref.dtype)


def _normalize(x3, scale, shift, nb, lb):
    N, C, L = x3.shape
    row_spec = pl.BlockSpec((nb, C, lb), lambda n, l: (n, 0, l))
    vec_spec = pl.BlockSpec((1, C, 1), lambda n, l: (0, 0, 0))
    return pl.pallas_call(
        _bn_kernel,
        out_shape=jax.ShapeDtypeStruct((N, C, L), x3.dtype),
        grid_spec=pltpu.PrefetchScalarGridSpec(
            num_scalar_prefetch=0,
            grid=(pl.cdiv(N, nb), pl.cdiv(L, lb)),
            in_specs=[row_spec, vec_spec, vec_spec],
            out_specs=row_spec,
        ),
        compiler_params=pltpu.CompilerParams(
            dimension_semantics=("parallel", "parallel"),
            vmem_limit_bytes=_VMEM_LIMIT_BYTES),
    )(x3, scale.reshape(1, C, 1), shift.reshape(1, C, 1))


# ----------------------------------------------------------------------------
# EstBN forward (matches the PyTorch module semantics)
# ----------------------------------------------------------------------------
@functools.partial(jax.jit, static_argnames=("training",))
def estbn_forward(x_nchw, params, training=True):
    """x_nchw: (N, C, H, W). params: dict with weight, bias, running_mean,
    running_var, estbn_moving_speed. Returns (out_nchw, new_params)."""
    N, C, H, W = x_nchw.shape
    L = H * W
    x3 = x_nchw.reshape(N, C, L)                # free reshape, NCHW-native

    weight = params["weight"].astype(jnp.float32)
    bias = params["bias"].astype(jnp.float32)
    running_mean = params["running_mean"]
    running_var = params["running_var"]
    ms = params["estbn_moving_speed"][0]

    nb, lb = _choose_tiles(N, C, L, x3.dtype.itemsize)

    if training:
        s, ssq = _channel_stats(x3, running_mean, nb, lb)   # native dtype in
        m = jnp.float32(N * L)
        batch_mean = s / m                      # inp_t.mean(dim=1)
        batch_var = ssq / m                     # mean((x - running_mean_old)^2)
        running_mean = running_mean * (1.0 - ms) + ms * batch_mean
        running_var = running_var * (1.0 - ms) + ms * batch_var

    # Fold weight/bias/running stats into per-channel scale & shift (C vecs).
    scale = weight * jax.lax.rsqrt(running_var.astype(jnp.float32) + 1e-5)
    shift = bias - running_mean.astype(jnp.float32) * scale

    out = _normalize(x3, scale, shift, nb, lb).reshape(N, C, H, W)

    new_params = dict(params)
    new_params["running_mean"] = running_mean
    new_params["running_var"] = running_var
    # num_batches_tracked is never touched by EstBN.forward — pass through.
    return out, new_params


def init_estbn_params(num_features):
    return {
        "weight": jnp.ones((num_features,), jnp.float32),
        "bias": jnp.zeros((num_features,), jnp.float32),
        "running_mean": jnp.zeros((num_features,), jnp.float32),
        "running_var": jnp.ones((num_features,), jnp.float32),
        "num_batches_tracked": jnp.array(0, jnp.int32),
        "estbn_moving_speed": jnp.zeros((1,), jnp.float32),
    }


# ----------------------------------------------------------------------------
# Pure-JAX reference for correctness check
# ----------------------------------------------------------------------------
def estbn_reference(x, params, training=True):
    C = params["weight"].shape[0]
    rm = params["running_mean"]
    rv = params["running_var"]
    ms = params["estbn_moving_speed"][0]
    if training:
        xt = jnp.transpose(x, (1, 0, 2, 3)).reshape(C, -1)
        bm = xt.mean(axis=1)
        d = xt - rm[:, None]
        bv = jnp.mean(d * d, axis=1)
        rm = rm * (1.0 - ms) + ms * bm
        rv = rv * (1.0 - ms) + ms * bv
    out = x - rm.reshape(1, -1, 1, 1)
    out = out / jnp.sqrt(rv + 1e-5).reshape(1, -1, 1, 1)
    out = params["weight"].reshape(1, -1, 1, 1) * out \
        + params["bias"].reshape(1, -1, 1, 1)
    return out, rm, rv


if __name__ == "__main__":
    def make_params(C):
        p = init_estbn_params(C)
        # Nonzero EMA speed + nontrivial buffers so the training path matters.
        p["estbn_moving_speed"] = jnp.array([0.3], jnp.float32)
        p["running_mean"] = jnp.linspace(-0.5, 0.5, C).astype(jnp.float32)
        p["running_var"] = jnp.linspace(0.5, 1.5, C).astype(jnp.float32)
        return p

    def check(shape, salt):
        N, C, H, W = shape
        key = jax.random.fold_in(jax.random.PRNGKey(0), salt)
        x = jax.random.normal(key, shape, dtype=jnp.float32) * 2.0 + 0.5
        params = make_params(C)

        out, new_params = estbn_forward(x, params, training=True)
        out = jax.block_until_ready(out)
        ref_out, ref_rm, ref_rv = estbn_reference(x, params, training=True)
        assert jnp.allclose(out, ref_out, atol=1e-4, rtol=1e-4), shape
        assert jnp.allclose(new_params["running_mean"], ref_rm, atol=1e-5), shape
        assert jnp.allclose(new_params["running_var"], ref_rv, atol=1e-4), shape

        out_e, _ = estbn_forward(x, params, training=False)
        ref_e, _, _ = estbn_reference(x, params, training=False)
        jax.block_until_ready(out_e)
        assert jnp.allclose(out_e, ref_e, atol=1e-4, rtol=1e-4), shape

    check((2, 4, 16, 16), 0)   # lane-aligned spatial, single tile
    check((2, 4, 47, 47), 1)   # L=2209: ragged lane tile (masking) + 2 shards
    print("KERNEL_OK")
</pallas_src>

<mosaic_0001>
module attributes {stable_mosaic.version = 11 : i64} {
  func.func @_stats_kernel(%arg0: i32, %arg1: i32, %arg2: i32, %arg3: memref<2x4x256xf32, #tpu.memory_space<vmem>>, %arg4: memref<1x4x1xf32, #tpu.memory_space<vmem>>, %arg5: memref<1x4x2xf32, #tpu.memory_space<vmem>>) attributes {dimension_semantics = [#tpu.dimension_semantics<parallel>, #tpu.dimension_semantics<arbitrary>, #tpu.dimension_semantics<arbitrary>], iteration_bounds = array<i64: 1, 1, 1>, scalar_prefetch = 0 : i64, scratch_operands = 0 : i64, tpu.core_type = #tpu.core_type<tc>, window_params = [{transform_indices = @transform_0, window_bounds = array<i64: 2, 4, 256>}, {pipeline_mode = #tpu.pipeline_mode<synchronous>, transform_indices = @transform_1, window_bounds = array<i64: 1, 4, 1>}, {transform_indices = @transform_2, window_bounds = array<i64: 1, 4, 2>}]} {
    %c0_i32 = arith.constant 0 : i32
    %0 = arith.cmpi eq, %arg1, %c0_i32 : i32
    %c0_i32_0 = arith.constant 0 : i32
    %1 = arith.cmpi eq, %arg2, %c0_i32_0 : i32
    %2 = arith.andi %0, %1 : i1
    %3 = arith.extui %2 : i1 to i32
    %c0_i32_1 = arith.constant 0 : i32
    %4 = arith.cmpi ne, %3, %c0_i32_1 : i32
    scf.if %4 {
      %cst_16 = arith.constant 0.000000e+00 : f32
      %21 = vector.broadcast %cst_16 : f32 to vector<1x4x2xf32>
      %c0_17 = arith.constant 0 : index
      %c0_18 = arith.constant 0 : index
      %c0_19 = arith.constant 0 : index
      %22 = vector.load %arg5[%c0_17, %c0_18, %c0_19] : memref<1x4x2xf32, #tpu.memory_space<vmem>>, vector<1x4x2xf32>
      tpu.vector_store %arg5[%c0_17, %c0_18, %c0_19], %21 {strides = array<i32>} : memref<1x4x2xf32, #tpu.memory_space<vmem>>, vector<1x4x2xf32>,
    } else {
    }
    %c0 = arith.constant 0 : index
    %c0_2 = arith.constant 0 : index
    %c0_3 = arith.constant 0 : index
    %5 = vector.load %arg3[%c0, %c0_2, %c0_3] : memref<2x4x256xf32, #tpu.memory_space<vmem>>, vector<2x4x256xf32>
    %c0_4 = arith.constant 0 : index
    %c0_5 = arith.constant 0 : index
    %c0_6 = arith.constant 0 : index
    %6 = vector.load %arg4[%c0_4, %c0_5, %c0_6] : memref<1x4x1xf32, #tpu.memory_space<vmem>>, vector<1x4x1xf32>
    %7 = vector.broadcast %6 : vector<1x4x1xf32> to vector<2x4x256xf32>
    %8 = arith.subf %5, %7 : vector<2x4x256xf32>
    %cst = arith.constant dense<0.000000e+00> : vector<4x256xf32>
    %9 = vector.multi_reduction <add>, %5, %cst [0] : vector<2x4x256xf32> to vector<4x256xf32>
    %10 = arith.mulf %8, %8 : vector<2x4x256xf32>
    %cst_7 = arith.constant dense<0.000000e+00> : vector<4x256xf32>
    %11 = vector.multi_reduction <add>, %10, %cst_7 [0] : vector<2x4x256xf32> to vector<4x256xf32>
    %cst_8 = arith.constant dense<0.000000e+00> : vector<4xf32>
    %12 = vector.multi_reduction <add>, %9, %cst_8 [1] : vector<4x256xf32> to vector<4xf32>
    %13 = vector.shape_cast %12 : vector<4xf32> to vector<4x1xf32>
    %cst_9 = arith.constant dense<0.000000e+00> : vector<4xf32>
    %14 = vector.multi_reduction <add>, %11, %cst_9 [1] : vector<4x256xf32> to vector<4xf32>
    %15 = vector.shape_cast %14 : vector<4xf32> to vector<4x1xf32>
    %c0_10 = arith.constant 0 : index
    %c0_11 = arith.constant 0 : index
    %c0_12 = arith.constant 0 : index
    %16 = vector.load %arg5[%c0_10, %c0_11, %c0_12] : memref<1x4x2xf32, #tpu.memory_space<vmem>>, vector<1x4x2xf32>
    %17 = tpu.concatenate %13, %15 in 1 : vector<4x1xf32>, vector<4x1xf32> -> vector<4x2xf32>
    %18 = vector.shape_cast %17 : vector<4x2xf32> to vector<1x4x2xf32>
    %19 = arith.addf %16, %18 : vector<1x4x2xf32>
    %c0_13 = arith.constant 0 : index
    %c0_14 = arith.constant 0 : index
    %c0_15 = arith.constant 0 : index
    %20 = vector.load %arg5[%c0_13, %c0_14, %c0_15] : memref<1x4x2xf32, #tpu.memory_space<vmem>>, vector<1x4x2xf32>
    tpu.vector_store %arg5[%c0_13, %c0_14, %c0_15], %19 {strides = array<i32>} : memref<1x4x2xf32, #tpu.memory_space<vmem>>, vector<1x4x2xf32>,
    return
  }
  func.func @transform_0(%arg0: i32, %arg1: i32, %arg2: i32) -> (i32, i32, i32) {
    %c1_i32 = arith.constant 1 : i32
    %0 = arith.muli %arg0, %c1_i32 : i32
    %1 = arith.addi %0, %arg2 : i32
    %c0_i32 = arith.constant 0 : i32
    %c0_i32_0 = arith.constant 0 : i32
    return %arg1, %c0_i32, %1 : i32, i32, i32
  }
  func.func @transform_1(%arg0: i32, %arg1: i32, %arg2: i32) -> (i32, i32, i32) {
    %c0_i32 = arith.constant 0 : i32
    %c0_i32_0 = arith.constant 0 : i32
    %c0_i32_1 = arith.constant 0 : i32
    %c0_i32_2 = arith.constant 0 : i32
    return %c0_i32, %c0_i32_0, %c0_i32_1 : i32, i32, i32
  }
  func.func @transform_2(%arg0: i32, %arg1: i32, %arg2: i32) -> (i32, i32, i32) {
    %c0_i32 = arith.constant 0 : i32
    %c0_i32_0 = arith.constant 0 : i32
    %c0_i32_1 = arith.constant 0 : i32
    return %arg0, %c0_i32, %c0_i32_0 : i32, i32, i32
  }
}

module attributes {stable_mosaic.version = 11 : i64} {
  func.func @_bn_kernel(%arg0: i32, %arg1: i32, %arg2: memref<2x4x256xf32, #tpu.memory_space<vmem>>, %arg3: memref<1x4x1xf32, #tpu.memory_space<vmem>>, %arg4: memref<1x4x1xf32, #tpu.memory_space<vmem>>, %arg5: memref<2x4x256xf32, #tpu.memory_space<vmem>>) attributes {dimension_semantics = [#tpu.dimension_semantics<parallel>, #tpu.dimension_semantics<parallel>], iteration_bounds = array<i64: 1, 1>, scalar_prefetch = 0 : i64, scratch_operands = 0 : i64, tpu.core_type = #tpu.core_type<tc>, window_params = [{transform_indices = @transform_0, window_bounds = array<i64: 2, 4, 256>}, {pipeline_mode = #tpu.pipeline_mode<synchronous>, transform_indices = @transform_1, window_bounds = array<i64: 1, 4, 1>}, {pipeline_mode = #tpu.pipeline_mode<synchronous>, transform_indices = @transform_2, window_bounds = array<i64: 1, 4, 1>}, {transform_indices = @transform_3, window_bounds = array<i64: 2, 4, 256>}]} {
    %c0 = arith.constant 0 : index
    %c0_0 = arith.constant 0 : index
    %c0_1 = arith.constant 0 : index
    %0 = vector.load %arg2[%c0, %c0_0, %c0_1] : memref<2x4x256xf32, #tpu.memory_space<vmem>>, vector<2x4x256xf32>
    %c0_2 = arith.constant 0 : index
    %c0_3 = arith.constant 0 : index
    %c0_4 = arith.constant 0 : index
    %1 = vector.load %arg3[%c0_2, %c0_3, %c0_4] : memref<1x4x1xf32, #tpu.memory_space<vmem>>, vector<1x4x1xf32>
    %2 = vector.broadcast %1 : vector<1x4x1xf32> to vector<2x4x256xf32>
    %3 = arith.mulf %0, %2 : vector<2x4x256xf32>
    %c0_5 = arith.constant 0 : index
    %c0_6 = arith.constant 0 : index
    %c0_7 = arith.constant 0 : index
    %4 = vector.load %arg4[%c0_5, %c0_6, %c0_7] : memref<1x4x1xf32, #tpu.memory_space<vmem>>, vector<1x4x1xf32>
    %5 = vector.broadcast %4 : vector<1x4x1xf32> to vector<2x4x256xf32>
    %6 = arith.addf %3, %5 : vector<2x4x256xf32>
    %c0_8 = arith.constant 0 : index
    %c0_9 = arith.constant 0 : index
    %c0_10 = arith.constant 0 : index
    %7 = vector.load %arg5[%c0_8, %c0_9, %c0_10] : memref<2x4x256xf32, #tpu.memory_space<vmem>>, vector<2x4x256xf32>
    tpu.vector_store %arg5[%c0_8, %c0_9, %c0_10], %6 {strides = array<i32>} : memref<2x4x256xf32, #tpu.memory_space<vmem>>, vector<2x4x256xf32>,
    return
  }
  func.func @transform_0(%arg0: i32, %arg1: i32) -> (i32, i32, i32) {
    %c0_i32 = arith.constant 0 : i32
    %c0_i32_0 = arith.constant 0 : i32
    return %arg0, %c0_i32, %arg1 : i32, i32, i32
  }
  func.func @transform_1(%arg0: i32, %arg1: i32) -> (i32, i32, i32) {
    %c0_i32 = arith.constant 0 : i32
    %c0_i32_0 = arith.constant 0 : i32
    %c0_i32_1 = arith.constant 0 : i32
    %c0_i32_2 = arith.constant 0 : i32
    return %c0_i32, %c0_i32_0, %c0_i32_1 : i32, i32, i32
  }
  func.func @transform_2(%arg0: i32, %arg1: i32) -> (i32, i32, i32) {
    %c0_i32 = arith.constant 0 : i32
    %c0_i32_0 = arith.constant 0 : i32
    %c0_i32_1 = arith.constant 0 : i32
    %c0_i32_2 = arith.constant 0 : i32
    return %c0_i32, %c0_i32_0, %c0_i32_1 : i32, i32, i32
  }
  func.func @transform_3(%arg0: i32, %arg1: i32) -> (i32, i32, i32) {
    %c0_i32 = arith.constant 0 : i32
    %c0_i32_0 = arith.constant 0 : i32
    return %arg0, %c0_i32, %arg1 : i32, i32, i32
  }
}

</mosaic_0001>

<bundles_post_ra>
// kernel: estbn_forward.2
= control target key start
LH: loop header
LB: loop body
LE: loop exit
PB: predicated region body
PF: predicated region fallthrough
CT: control target
= control target key end

     0   :  { %v117_v0 = vmov 0   ;;  %vm64_vm0 = vcmask 1043456   ;;  %vm39_vm1 = vcmask 11264   ;;  %v118_v15 = vmov 0.0   ;;  %s167_s1 = inlined_call_operand.vmem [shape: f32[1,4,1], index: 1, kind: input, shape index: {}]   ;;  %s168_s0 = inlined_call_operand.vmem [shape: f32[2,4,256], index: 0, kind: input, shape index: {}]   ;;  %s169_s2 = inlined_call_operand.vmem [shape: f32[1,4,2], index: 2, kind: output, shape index: {}]  }
   0x1   :  { %114 = vset.pattern.permute.xlu0 %v117_v0  ;;  %v43_v1 = vld [vmem:[%s167_s1] sm:$0xf]  ;;  %v42_v3 = vld [vmem:[%s168_s0 + $0x8] sm:$0xff]  ;;  %40 = vst.msk [vmem:[%s169_s2] sm:$0xf] %vm39_vm1, %v118_v15  ;;  %v51_v18 = vlaneseq  ;;  %vm96_vm2 = vcmask 7168  }
   0x2   :  { %46 = vperm.xlu0 %114, %v43_v1   ;;  %v41_v2 = vld [vmem:[%s168_s0] sm:$0xff]  ;;  %v61_v5 = vcombine.high %v42_v3, %v42_v3  ;;  %v66_v7 = vsel %vm64_vm0, %v42_v3, 0.0  ;;  %v119_v16 = vmov 839922192  }
   0x3   :  { %v60_v4 = vcombine.high %v41_v2, %v41_v2  ;;  %v65_v6 = vsel %vm64_vm0, %v41_v2, 0.0  ;;  %v49_v17 = vunpack.c.l.s4 %v119_v16  ;;  %v52_v20 = vshrl.u32 %v51_v18, 7 }
   0x4   :  { %v69_v9 = vsel %vm64_vm0, %v61_v5, 0.0  ;;  %v67_v10 = vadd.f32 %v66_v7, %v65_v6 }
   0x5   :  { %v68_v8 = vsel %vm64_vm0, %v60_v4, 0.0  ;;  %v50_v19 = vunpack.c.0.s8 %v49_v17 }
   0x6   :  { %v70_v11 = vadd.f32 %v69_v9, %v68_v8  ;;  %v85_v12 = vsel %vm64_vm0, %v67_v10, 0.0 }
   0x7   :  { %v53_v21 = vsub.s32 %v50_v19, %v52_v20 }
   0x8   :  { %v86_v13 = vsel %vm64_vm0, %v70_v11, 0.0  ;;  %v95_v40 = vld [vmem:[%s169_s2] sm:$0xf] }
   0x9   :  { %v87_v14 = vadd.f32 %v86_v13, %v85_v12 }
  0x21   :  { %88 = vadd.xlane.f32.xlu0 %v87_v14 }
  0x81   :  { %v47_v22 = vpop.permute.xlu0 %46 }
  0x82   :  { %v54_v23 = vrot.slane %v47_v22, %v53_v21 }
  0x84   :  { %v56_v24 = vsub.f32 %v41_v2, %v54_v23  ;;  %v57_v25 = vsub.f32 %v42_v3, %v54_v23 }
  0x86   :  { %v71_v26 = vmul.f32 %v56_v24, %v56_v24  ;;  %v72_v27 = vmul.f32 %v57_v25, %v57_v25 }
  0x88   :  { %v75_v28 = vcombine.high %v71_v26, %v71_v26  ;;  %v76_v29 = vcombine.high %v72_v27, %v72_v27  ;;  %v79_v30 = vsel %vm64_vm0, %v71_v26, 0.0  ;;  %v80_v31 = vsel %vm64_vm0, %v72_v27, 0.0 }
  0x89   :  { %v81_v32 = vadd.f32 %v80_v31, %v79_v30 }
  0x8a   :  { %v82_v33 = vsel %vm64_vm0, %v75_v28, 0.0  ;;  %v83_v34 = vsel %vm64_vm0, %v76_v29, 0.0 }
  0x8b   :  { %v84_v35 = vadd.f32 %v83_v34, %v82_v33  ;;  %v90_v36 = vsel %vm64_vm0, %v81_v32, 0.0 }
  0x8d   :  { %v91_v37 = vsel %vm64_vm0, %v84_v35, 0.0 }
  0x8e   :  { %v92_v38 = vadd.f32 %v91_v37, %v90_v36 }
  0x90   :  { %93 = vadd.xlane.f32.xlu1 %v92_v38 }
  0xae   :  { %v89_v39 = vpop.xlane.xlu0 %88 }
 0x11d   :  { %v94_v41 = vpop.xlane.xlu1 %93 }
 0x11e   :  { %v97_v42 = vsel %vm96_vm2, %v89_v39, %v94_v41 }
 0x11f   :  { %v98_v43 = vadd.f32 %v97_v42, %v95_v40 }
 0x121   :  { %100 = vst.msk [vmem:[%s169_s2] sm:$0xf] %vm39_vm1, %v98_v43 }

// kernel: estbn_forward.3
= control target key start
LH: loop header
LB: loop body
LE: loop exit
PB: predicated region body
PF: predicated region fallthrough
CT: control target
= control target key end

     0   :  { %v55_v0 = vmov 0   ;;  %v56_v3 = vmov 839922192   ;;  %v24_v5 = vlaneseq  ;;  %s95_s1 = inlined_call_operand.vmem [shape: f32[1,4,1], index: 1, kind: input, shape index: {}]   ;;  %s96_s2 = inlined_call_operand.vmem [shape: f32[1,4,1], index: 2, kind: input, shape index: {}]   ;;  %s97_s0 = inlined_call_operand.vmem [shape: f32[2,4,256], index: 0, kind: input, shape index: {}]   ;;  %s98_s3 = inlined_call_operand.vmem [shape: f32[2,4,256], index: 3, kind: output, shape index: {}]  }
   0x1   :  { %54 = vset.pattern.permute.xlu0 %v55_v0  ;;  %v16_v1 = vld [vmem:[%s95_s1] sm:$0xf]  ;;  %v22_v4 = vunpack.c.l.s4 %v56_v3  ;;  %v15_v12 = vld [vmem:[%s97_s0 + $0x8] sm:$0xff] }
   0x2   :  { %19 = vperm.xlu0 %54, %v16_v1   ;;  %v31_v2 = vld [vmem:[%s96_s2] sm:$0xf]  ;;  %v25_v7 = vshrl.u32 %v24_v5, 7 }
   0x3   :  { %v23_v6 = vunpack.c.0.s8 %v22_v4  ;;  %v14_v11 = vld [vmem:[%s97_s0] sm:$0xff] }
   0x5   :  { %v26_v8 = vsub.s32 %v23_v6, %v25_v7 }
   0x6   :  { %34 = vperm.xlu0 %54, %v31_v2  }
  0x81   :  { %v20_v9 = vpop.permute.xlu0 %19 }
  0x82   :  { %v27_v10 = vrot.slane %v20_v9, %v26_v8 }
  0x84   :  { %v29_v14 = vmul.f32 %v27_v10, %v14_v11  ;;  %v30_v15 = vmul.f32 %v27_v10, %v15_v12 }
  0x85   :  { %v35_v13 = vpop.permute.xlu0 %34 }
  0x86   :  { %v42_v16 = vrot.slane %v35_v13, %v26_v8 }
  0x88   :  { %v44_v17 = vadd.f32 %v42_v16, %v29_v14  ;;  %v45_v18 = vadd.f32 %v42_v16, %v30_v15 }
  0x8a   :  { %46 = vst [vmem:[%s98_s3] sm:$0xff] %v44_v17  ;;  %47 = vst [vmem:[%s98_s3 + $0x8] sm:$0xff] %v45_v18 }

</bundles_post_ra>
